<compile_context>
chip_gen: v5e
topology: v5e:2x2
jax: 0.10.0
libtpu: 0.0.40
codegen_flags: <defaults>
</compile_context>

<pallas_src>
import math
import functools

import jax
import jax.numpy as jnp
from jax import lax
from jax.experimental import pallas as pl
from jax.experimental.pallas import tpu as pltpu


def _round_up(x, m):
    return ((x + m - 1) // m) * m


def _linear_kernel(x_ref, w_ref, b_ref, o_ref, acc_ref):
    # x_ref: (tm, tk)   w_ref: (tn, tk)   b_ref: (1, tn)   o_ref: (tm, tn)
    # acc_ref: (tm, tn) f32 scratch, persists across the K grid axis (axis 2).
    k = pl.program_id(2)

    @pl.when(k == 0)
    def _init():
        acc_ref[...] = jnp.zeros_like(acc_ref)

    # Contract x's last dim with weight's last dim (PyTorch layout, no transpose needed).
    acc_ref[...] += lax.dot_general(
        x_ref[...],
        w_ref[...],
        dimension_numbers=(((1,), (1,)), ((), ())),
        preferred_element_type=jnp.float32,
    )

    @pl.when(k == pl.num_programs(2) - 1)
    def _finalize():
        o_ref[...] = (acc_ref[...] + b_ref[...].astype(jnp.float32)).astype(o_ref.dtype)


@functools.partial(jax.jit, static_argnames=("tm", "tn", "tk"))
def pallas_linear(x, weight, bias=None, *, tm=256, tn=256, tk=512):
    """y = x @ weight.T + bias  (matches torch.nn.Linear forward).

    x:      (..., in_dim)
    weight: (out_dim, in_dim)   -- PyTorch layout, used as-is (no transpose)
    bias:   (out_dim,) or None
    """
    orig_shape = x.shape
    in_dim = orig_shape[-1]
    out_dim = weight.shape[0]

    x2d = x.reshape(-1, in_dim)
    M = x2d.shape[0]

    if bias is None:
        bias = jnp.zeros((out_dim,), dtype=weight.dtype)

    # --- tile sizes: sublane-aligned M tile, lane-dense (128-multiple) N/K tiles ---
    m_align = 16 if x.dtype == jnp.bfloat16 else 8
    tm = _round_up(min(tm, _round_up(M, m_align)), m_align)
    tn = _round_up(min(tn, _round_up(out_dim, 128)), 128)
    tk = _round_up(min(tk, _round_up(in_dim, 128)), 128)

    # --- pad to tile multiples (zeros keep the matmul exact); slice back at the end ---
    M_pad = _round_up(M, tm)
    N_pad = _round_up(out_dim, tn)
    K_pad = _round_up(in_dim, tk)

    if (M_pad != M) or (K_pad != in_dim):
        x2d = jnp.pad(x2d, ((0, M_pad - M), (0, K_pad - in_dim)))
    w = weight
    if (N_pad != out_dim) or (K_pad != in_dim):
        w = jnp.pad(w, ((0, N_pad - out_dim), (0, K_pad - in_dim)))
    b2d = bias.reshape(1, out_dim)
    if N_pad != out_dim:
        b2d = jnp.pad(b2d, ((0, 0), (0, N_pad - out_dim)))

    grid = (M_pad // tm, N_pad // tn, K_pad // tk)

    y2d = pl.pallas_call(
        _linear_kernel,
        out_shape=jax.ShapeDtypeStruct((M_pad, N_pad), x.dtype),
        grid_spec=pltpu.PrefetchScalarGridSpec(
            num_scalar_prefetch=0,
            grid=grid,
            in_specs=[
                pl.BlockSpec((tm, tk), lambda i, j, k: (i, k)),   # x tile
                pl.BlockSpec((tn, tk), lambda i, j, k: (j, k)),   # weight tile (no T)
                pl.BlockSpec((1, tn), lambda i, j, k: (0, j)),    # bias tile
            ],
            out_specs=pl.BlockSpec((tm, tn), lambda i, j, k: (i, j)),
            scratch_shapes=[pltpu.VMEM((tm, tn), jnp.float32)],
        ),
        compiler_params=pltpu.CompilerParams(
            dimension_semantics=("parallel", "parallel", "arbitrary"),
            vmem_limit_bytes=32 * 1024 * 1024,
        ),
    )(x2d, w, b2d)

    y2d = y2d[:M, :out_dim]
    return y2d.reshape(*orig_shape[:-1], out_dim)


def init_linear_params(key, in_dim, out_dim, w_init="linear"):
    """xavier_uniform_ with gain = calculate_gain(w_init); bias init like nn.Linear default."""
    gain = 1.0  # torch.nn.init.calculate_gain('linear') == 1.0
    k_w, k_b = jax.random.split(key)
    limit = gain * math.sqrt(6.0 / (in_dim + out_dim))
    weight = jax.random.uniform(
        k_w, (out_dim, in_dim), minval=-limit, maxval=limit, dtype=jnp.float32
    )
    # torch default bias init: U(-1/sqrt(fan_in), 1/sqrt(fan_in))
    b_bound = 1.0 / math.sqrt(in_dim)
    bias = jax.random.uniform(
        k_b, (out_dim,), minval=-b_bound, maxval=b_bound, dtype=jnp.float32
    )
    return weight, bias


if __name__ == "__main__":
    key = jax.random.PRNGKey(0)
    k_x, k_p = jax.random.split(key)

    batch, seq, in_dim, out_dim = 2, 8, 32, 32
    x = jax.random.normal(k_x, (batch, seq, in_dim), dtype=jnp.float32)
    weight, bias = init_linear_params(k_p, in_dim, out_dim, w_init="linear")

    y = pallas_linear(x, weight, bias)
    jax.block_until_ready(y)

    # correctness check vs plain-JAX reference
    y_ref = x @ weight.T + bias
    assert y.shape == (batch, seq, out_dim)
    assert jnp.allclose(y, y_ref, atol=1e-5, rtol=1e-5)

    print("KERNEL_OK")
</pallas_src>

<mosaic_0001>
module attributes {stable_mosaic.version = 11 : i64} {
  func.func @_linear_kernel(%arg0: i32, %arg1: i32, %arg2: i32, %arg3: memref<16x128xf32, #tpu.memory_space<vmem>>, %arg4: memref<128x128xf32, #tpu.memory_space<vmem>>, %arg5: memref<1x128xf32, #tpu.memory_space<vmem>>, %arg6: memref<16x128xf32, #tpu.memory_space<vmem>>, %arg7: memref<16x128xf32, #tpu.memory_space<vmem>>) attributes {dimension_semantics = [#tpu.dimension_semantics<parallel>, #tpu.dimension_semantics<parallel>, #tpu.dimension_semantics<arbitrary>], iteration_bounds = array<i64: 1, 1, 1>, scalar_prefetch = 0 : i64, scratch_operands = 1 : i64, tpu.core_type = #tpu.core_type<tc>, window_params = [{transform_indices = @transform_0, window_bounds = array<i64: 16, 128>}, {transform_indices = @transform_1, window_bounds = array<i64: 128, 128>}, {transform_indices = @transform_2, window_bounds = array<i64: 1, 128>}, {transform_indices = @transform_3, window_bounds = array<i64: 16, 128>}]} {
    %c0_i32 = arith.constant 0 : i32
    %0 = arith.cmpi eq, %arg2, %c0_i32 : i32
    %1 = arith.extui %0 : i1 to i32
    %c0_i32_0 = arith.constant 0 : i32
    %2 = arith.cmpi ne, %1, %c0_i32_0 : i32
    scf.if %2 {
      %cst_10 = arith.constant 0.000000e+00 : f32
      %12 = vector.broadcast %cst_10 : f32 to vector<16x128xf32>
      %c0_11 = arith.constant 0 : index
      %c0_12 = arith.constant 0 : index
      %13 = vector.load %arg7[%c0_11, %c0_12] : memref<16x128xf32, #tpu.memory_space<vmem>>, vector<16x128xf32>
      tpu.vector_store %arg7[%c0_11, %c0_12], %12 {strides = array<i32>} : memref<16x128xf32, #tpu.memory_space<vmem>>, vector<16x128xf32>,
    } else {
    }
    %c0 = arith.constant 0 : index
    %c0_1 = arith.constant 0 : index
    %3 = vector.load %arg7[%c0, %c0_1] : memref<16x128xf32, #tpu.memory_space<vmem>>, vector<16x128xf32>
    %c0_2 = arith.constant 0 : index
    %c0_3 = arith.constant 0 : index
    %4 = vector.load %arg3[%c0_2, %c0_3] : memref<16x128xf32, #tpu.memory_space<vmem>>, vector<16x128xf32>
    %c0_4 = arith.constant 0 : index
    %c0_5 = arith.constant 0 : index
    %5 = vector.load %arg4[%c0_4, %c0_5] : memref<128x128xf32, #tpu.memory_space<vmem>>, vector<128x128xf32>
    %cst = arith.constant dense<0.000000e+00> : vector<16x128xf32>
    %6 = tpu.matmul %4, %5, %cst {dimension_numbers = #tpu.dot_dimension_numbers<[1], [1], [0], [0], [0, 0, 1, 0], [], []>} : vector<16x128xf32>, vector<128x128xf32>, vector<16x128xf32> -> vector<16x128xf32>
    %7 = arith.addf %3, %6 : vector<16x128xf32>
    %c0_6 = arith.constant 0 : index
    %c0_7 = arith.constant 0 : index
    %8 = vector.load %arg7[%c0_6, %c0_7] : memref<16x128xf32, #tpu.memory_space<vmem>>, vector<16x128xf32>
    tpu.vector_store %arg7[%c0_6, %c0_7], %7 {strides = array<i32>} : memref<16x128xf32, #tpu.memory_space<vmem>>, vector<16x128xf32>,
    %c0_i32_8 = arith.constant 0 : i32
    %9 = arith.cmpi eq, %arg2, %c0_i32_8 : i32
    %10 = arith.extui %9 : i1 to i32
    %c0_i32_9 = arith.constant 0 : i32
    %11 = arith.cmpi ne, %10, %c0_i32_9 : i32
    scf.if %11 {
      %c0_10 = arith.constant 0 : index
      %c0_11 = arith.constant 0 : index
      %12 = vector.load %arg7[%c0_10, %c0_11] : memref<16x128xf32, #tpu.memory_space<vmem>>, vector<16x128xf32>
      %c0_12 = arith.constant 0 : index
      %c0_13 = arith.constant 0 : index
      %13 = vector.load %arg5[%c0_12, %c0_13] : memref<1x128xf32, #tpu.memory_space<vmem>>, vector<1x128xf32>
      %14 = vector.broadcast %13 : vector<1x128xf32> to vector<16x128xf32>
      %15 = arith.addf %12, %14 : vector<16x128xf32>
      %c0_14 = arith.constant 0 : index
      %c0_15 = arith.constant 0 : index
      %16 = vector.load %arg6[%c0_14, %c0_15] : memref<16x128xf32, #tpu.memory_space<vmem>>, vector<16x128xf32>
      tpu.vector_store %arg6[%c0_14, %c0_15], %15 {strides = array<i32>} : memref<16x128xf32, #tpu.memory_space<vmem>>, vector<16x128xf32>,
    } else {
    }
    return
  }
  func.func @transform_0(%arg0: i32, %arg1: i32, %arg2: i32) -> (i32, i32) {
    %c0_i32 = arith.constant 0 : i32
    return %arg0, %arg2 : i32, i32
  }
  func.func @transform_1(%arg0: i32, %arg1: i32, %arg2: i32) -> (i32, i32) {
    %c0_i32 = arith.constant 0 : i32
    return %arg1, %arg2 : i32, i32
  }
  func.func @transform_2(%arg0: i32, %arg1: i32, %arg2: i32) -> (i32, i32) {
    %c0_i32 = arith.constant 0 : i32
    %c0_i32_0 = arith.constant 0 : i32
    return %c0_i32, %arg1 : i32, i32
  }
  func.func @transform_3(%arg0: i32, %arg1: i32, %arg2: i32) -> (i32, i32) {
    %c0_i32 = arith.constant 0 : i32
    return %arg0, %arg1 : i32, i32
  }
}

</mosaic_0001>

<bundles_post_ra>
// kernel: pallas_linear.1
= control target key start
LH: loop header
LB: loop body
LE: loop exit
PB: predicated region body
PF: predicated region fallthrough
CT: control target
= control target key end

     0   :  { %s184_s1 = inlined_call_operand.vmem [shape: f32[128,128], index: 1, kind: input, shape index: {}]   ;;  %s185_s2 = inlined_call_operand.vmem [shape: f32[1,128], index: 2, kind: input, shape index: {}]   ;;  %s186_s0 = inlined_call_operand.vmem [shape: f32[16,128], index: 0, kind: input, shape index: {}]   ;;  %s187_s3 = inlined_call_operand.vmem [shape: f32[16,128], index: 3, kind: output, shape index: {}]  }
   0x1   :  { %v39_v0 = vld [vmem:[%s184_s1 + $0x78] sm:$0xff]  ;;  %v38_v1 = vld [vmem:[%s184_s1 + $0x70] sm:$0xff]  ;;  %v37_v2 = vld [vmem:[%s184_s1 + $0x68] sm:$0xff] }
   0x2   :  { %40 = vmatpush.xpose.msra.mxu0 %v39_v0  ;;  %84 = vmatpush.xpose.msra.mxu1 %v39_v0  ;;  %v36_v3 = vld [vmem:[%s184_s1 + $0x60] sm:$0xff]  ;;  %v35_v4 = vld [vmem:[%s184_s1 + $0x58] sm:$0xff]  ;;  %v34_v5 = vld [vmem:[%s184_s1 + $0x50] sm:$0xff] }
   0x3   :  { %v33_v6 = vld [vmem:[%s184_s1 + $0x48] sm:$0xff]  ;;  %v32_v7 = vld [vmem:[%s184_s1 + $0x40] sm:$0xff]  ;;  %v31_v8 = vld [vmem:[%s184_s1 + $0x38] sm:$0xff] }
   0x4   :  { %v30_v9 = vld [vmem:[%s184_s1 + $0x30] sm:$0xff]  ;;  %v29_v10 = vld [vmem:[%s184_s1 + $0x28] sm:$0xff]  ;;  %v28_v11 = vld [vmem:[%s184_s1 + $0x20] sm:$0xff] }
   0x5   :  { %v27_v12 = vld [vmem:[%s184_s1 + $0x18] sm:$0xff]  ;;  %v26_v13 = vld [vmem:[%s184_s1 + $0x10] sm:$0xff]  ;;  %v25_v14 = vld [vmem:[%s184_s1 + $0x8] sm:$0xff] }
   0x6   :  { %41 = vmatpush.xpose.msra.mxu0 %v38_v1  ;;  %85 = vmatpush.xpose.msra.mxu1 %v38_v1  ;;  %v24_v15 = vld [vmem:[%s184_s1] sm:$0xff]  ;;  %v23_v17 = vld [vmem:[%s186_s0 + $0x8] sm:$0xff] }
   0x7   :  { %v22_v16 = vld [vmem:[%s186_s0] sm:$0xff] }
   0x8   :  { %v100_v18 = vld [vmem:[%s185_s2] ss:$0 sm:$0xff] }
   0xa   :  { %42 = vmatpush.xpose.msra.mxu0 %v37_v2  ;;  %86 = vmatpush.xpose.msra.mxu1 %v37_v2 }
   0xe   :  { %43 = vmatpush.xpose.msra.mxu0 %v36_v3  ;;  %87 = vmatpush.xpose.msra.mxu1 %v36_v3 }
  0x12   :  { %44 = vmatpush.xpose.msra.mxu0 %v35_v4  ;;  %88 = vmatpush.xpose.msra.mxu1 %v35_v4 }
  0x16   :  { %45 = vmatpush.xpose.msra.mxu0 %v34_v5  ;;  %89 = vmatpush.xpose.msra.mxu1 %v34_v5 }
  0x1a   :  { %46 = vmatpush.xpose.msra.mxu0 %v33_v6  ;;  %90 = vmatpush.xpose.msra.mxu1 %v33_v6 }
  0x1e   :  { %47 = vmatpush.xpose.msra.mxu0 %v32_v7  ;;  %91 = vmatpush.xpose.msra.mxu1 %v32_v7 }
  0x22   :  { %48 = vmatpush.xpose.msra.mxu0 %v31_v8  ;;  %92 = vmatpush.xpose.msra.mxu1 %v31_v8 }
  0x26   :  { %49 = vmatpush.xpose.msra.mxu0 %v30_v9  ;;  %93 = vmatpush.xpose.msra.mxu1 %v30_v9 }
  0x2a   :  { %50 = vmatpush.xpose.msra.mxu0 %v29_v10  ;;  %94 = vmatpush.xpose.msra.mxu1 %v29_v10 }
  0x2e   :  { %51 = vmatpush.xpose.msra.mxu0 %v28_v11  ;;  %95 = vmatpush.xpose.msra.mxu1 %v28_v11 }
  0x32   :  { %52 = vmatpush.xpose.msra.mxu0 %v27_v12  ;;  %96 = vmatpush.xpose.msra.mxu1 %v27_v12 }
  0x36   :  { %53 = vmatpush.xpose.msra.mxu0 %v26_v13  ;;  %97 = vmatpush.xpose.msra.mxu1 %v26_v13 }
  0x3a   :  { %54 = vmatpush.xpose.msra.mxu0 %v25_v14  ;;  %98 = vmatpush.xpose.msra.mxu1 %v25_v14 }
  0x3e   :  { %55 = vmatpush.xpose.msra.mxu0 %v24_v15  ;;  %99 = vmatpush.xpose.msra.mxu1 %v24_v15 }
  0x41   :  { %56 = vmatmul.f32.vlgmr.msra.gmra.mxu0 %v22_v16  ;;  %59 = vmatmul.f32.vlgmr.msra.gmra.mxu1 %v23_v17 }
  0xbe   :  { %v57_v19 = vpop.f32.mrf.mxu0  ;;  %v60_v20 = vpop.f32.mrf.mxu1 }
  0xbf   :  { %v76_v21 = vadd.f32 %v100_v18, %v57_v19  ;;  %v77_v22 = vadd.f32 %v100_v18, %v60_v20 }
  0xc1   :  { %78 = vst [vmem:[%s187_s3] sm:$0xff] %v76_v21 }
  0xc2   :  { %79 = vst [vmem:[%s187_s3 + $0x8] sm:$0xff] %v77_v22 }

</bundles_post_ra>
